<compile_context>
chip_gen: v6e
topology: v6e:2x2x1
jax: 0.10.0
libtpu: 0.0.40
codegen_flags: <defaults>
</compile_context>

<pallas_src>
import jax
import jax.numpy as jnp
from jax.experimental import pallas as pl
from jax.experimental.pallas import tpu as pltpu

LANE = 128       # TPU lane width; padded width of every intermediate
SUB = 8          # sublane granularity
HIDDEN1 = 64     # true width of first hidden layer
HIDDEN2 = 128    # true width of second hidden layer
W_ROWS = 392     # 3*128 weight rows + 8 tail rows (biases / gamma / beta)


# --------------------------------------------------------------------------
# Kernel: whole MLP + LayerNorm in one grid-less invocation.
#   slab_ref: (392 + Tpad, 128) f32 packed params + token
#             rows [  0:128)        = w1 padded (zero rows >= token_dim, cols >= 64)
#             rows [128:256)        = w2 padded (zero rows >= 64)
#             rows [256:384)        = w3
#             rows [384:392)        = b1 | b2 | b3 | gamma | beta | 0 | 0 | 0
#             rows [392:392+Tpad)   = token, zero-padded to 128 cols / Tpad rows
#   out_ref : (Tpad, 128) f32
# --------------------------------------------------------------------------
def _make_encoder_kernel(t_pad):
    def kernel(slab_ref, out_ref):
        w1 = slab_ref[0:128, :]
        w2 = slab_ref[128:256, :]
        w3 = slab_ref[256:384, :]
        tail = slab_ref[384:392, :]                   # one aligned (8,128) load
        b1 = tail[0:1, :]
        b2 = tail[1:2, :]
        b3 = tail[2:3, :]
        gamma = tail[3:4, :]
        beta = tail[4:5, :]
        x = slab_ref[W_ROWS:W_ROWS + t_pad, :]        # (Tpad, 128)

        # Linear(token_dim -> 64) + ReLU   (lane-padded to 128; pad cols stay 0)
        h1 = jnp.maximum(
            jnp.dot(x, w1, preferred_element_type=jnp.float32) + b1, 0.0)
        # Linear(64 -> 128) + ReLU
        h2 = jnp.maximum(
            jnp.dot(h1, w2, preferred_element_type=jnp.float32) + b2, 0.0)
        # Linear(128 -> projection_dim)
        h3 = jnp.dot(h2, w3, preferred_element_type=jnp.float32) + b3

        # LayerNorm over the last axis (eps matches torch default 1e-5)
        mean = jnp.mean(h3, axis=-1, keepdims=True)
        centered = h3 - mean
        var = jnp.mean(centered * centered, axis=-1, keepdims=True)
        inv = jax.lax.rsqrt(var + 1e-5)
        out_ref[...] = (centered * inv * gamma + beta).astype(out_ref.dtype)

    return kernel


# --------------------------------------------------------------------------
# Host-side packing (done ONCE at init, not per forward call).
# --------------------------------------------------------------------------
def pack_inputs(radio_token, params):
    """Pack token + 8 params into ONE lane-dense slab for the kernel."""
    token_size, token_dim = radio_token.shape
    projection_dim = params["w3"].shape[1]
    # TODO(synk): generalize the single-slab packing to projection_dim != 128
    # (would need a second, P-wide slab for w3/b3/gamma/beta).
    assert projection_dim == LANE, "packing assumes projection_dim == 128"
    assert token_dim <= LANE and HIDDEN1 <= LANE and HIDDEN2 == LANE

    t_pad = ((token_size + SUB - 1) // SUB) * SUB

    w1p = jnp.zeros((LANE, LANE), jnp.float32)
    w1p = w1p.at[:token_dim, :HIDDEN1].set(params["w1"].astype(jnp.float32))
    w2p = jnp.zeros((LANE, LANE), jnp.float32)
    w2p = w2p.at[:HIDDEN1, :HIDDEN2].set(params["w2"].astype(jnp.float32))
    w3p = params["w3"].astype(jnp.float32)                       # (128, 128)

    tail = jnp.zeros((SUB, LANE), jnp.float32)
    tail = tail.at[0, :HIDDEN1].set(params["b1"].reshape(-1))
    tail = tail.at[1, :HIDDEN2].set(params["b2"].reshape(-1))
    tail = tail.at[2, :projection_dim].set(params["b3"].reshape(-1))
    tail = tail.at[3, :projection_dim].set(params["gamma"].reshape(-1))
    tail = tail.at[4, :projection_dim].set(params["beta"].reshape(-1))

    tok_pad = jnp.zeros((t_pad, LANE), jnp.float32)
    tok_pad = tok_pad.at[:token_size, :token_dim].set(
        radio_token.astype(jnp.float32))

    slab = jnp.concatenate([w1p, w2p, w3p, tail, tok_pad], axis=0)
    return slab, token_size, t_pad


def modality_token_encoder(slab, token_size, t_pad):
    """Forward pass on the pre-packed slab.  Single invocation, no grid."""
    vmem = pl.BlockSpec(memory_space=pltpu.MemorySpace.VMEM)
    out = pl.pallas_call(
        _make_encoder_kernel(t_pad),
        out_shape=jax.ShapeDtypeStruct((t_pad, LANE), jnp.float32),
        in_specs=[vmem],
        out_specs=vmem,
    )(slab)
    return out[:token_size]


# --------------------------------------------------------------------------
# Synthetic init mirroring the PyTorch module, plus a pure-JAX reference.
# --------------------------------------------------------------------------
def init_params(key, token_size, token_dim, projection_dim):
    ks = jax.random.split(key, 8)
    # radio_token ~ Normal(0, std) with std ~ U[0.1, 0.6)
    std = jax.random.uniform(ks[0], ()) * 0.5 + 0.1
    radio_token = std * jax.random.normal(ks[1], (token_size, token_dim),
                                          jnp.float32)

    def linear(kw, fan_in, fan_out):
        # torch.nn.Linear default: U(-1/sqrt(fan_in), 1/sqrt(fan_in))
        bound = 1.0 / jnp.sqrt(fan_in)
        kw1, kw2 = jax.random.split(kw)
        w = jax.random.uniform(kw1, (fan_in, fan_out), jnp.float32, -bound, bound)
        b = jax.random.uniform(kw2, (1, fan_out), jnp.float32, -bound, bound)
        return w, b

    w1, b1 = linear(ks[2], token_dim, HIDDEN1)
    w2, b2 = linear(ks[3], HIDDEN1, HIDDEN2)
    w3, b3 = linear(ks[4], HIDDEN2, projection_dim)
    gamma = jnp.ones((1, projection_dim), jnp.float32)
    beta = jnp.zeros((1, projection_dim), jnp.float32)

    params = dict(w1=w1, b1=b1, w2=w2, b2=b2, w3=w3, b3=b3,
                  gamma=gamma, beta=beta)
    return radio_token, params


def _reference(radio_token, p):
    h = jnp.maximum(radio_token @ p["w1"] + p["b1"], 0.0)
    h = jnp.maximum(h @ p["w2"] + p["b2"], 0.0)
    h = h @ p["w3"] + p["b3"]
    mean = h.mean(-1, keepdims=True)
    var = ((h - mean) ** 2).mean(-1, keepdims=True)
    return (h - mean) / jnp.sqrt(var + 1e-5) * p["gamma"] + p["beta"]


if __name__ == "__main__":
    token_size = 8        # CFG.token_size  (small synthetic value)
    token_dim = 32        # CFG.token_dim
    projection_dim = 128  # CFG.projection_dim

    key = jax.random.PRNGKey(0)
    radio_token, params = init_params(key, token_size, token_dim,
                                      projection_dim)

    # Pack once at init -> ONE lane-dense buffer -> one input DMA per call.
    slab, tsz, t_pad = pack_inputs(radio_token, params)
    slab = jax.block_until_ready(slab)

    out = modality_token_encoder(slab, tsz, t_pad)
    out = jax.block_until_ready(out)

    ref = _reference(radio_token, params)
    assert out.shape == (token_size, projection_dim)
    assert jnp.allclose(out, ref, atol=1e-4, rtol=1e-4), "mismatch vs reference"

    print("KERNEL_OK")
</pallas_src>

<mosaic_0001>
module attributes {stable_mosaic.version = 11 : i64} {
  func.func @kernel(%arg0: memref<400x128xf32, #tpu.memory_space<vmem>>, %arg1: memref<8x128xf32, #tpu.memory_space<vmem>>) attributes {dimension_semantics = [], scalar_prefetch = 0 : i64, scratch_operands = 0 : i64, tpu.core_type = #tpu.core_type<tc>} {
    %c0 = arith.constant 0 : index
    %c0_0 = arith.constant 0 : index
    %0 = vector.load %arg0[%c0, %c0_0] : memref<400x128xf32, #tpu.memory_space<vmem>>, vector<128x128xf32>
    %c128 = arith.constant 128 : index
    %c0_1 = arith.constant 0 : index
    %1 = vector.load %arg0[%c128, %c0_1] : memref<400x128xf32, #tpu.memory_space<vmem>>, vector<128x128xf32>
    %c256 = arith.constant 256 : index
    %c0_2 = arith.constant 0 : index
    %2 = vector.load %arg0[%c256, %c0_2] : memref<400x128xf32, #tpu.memory_space<vmem>>, vector<128x128xf32>
    %c384 = arith.constant 384 : index
    %c0_3 = arith.constant 0 : index
    %3 = vector.load %arg0[%c384, %c0_3] : memref<400x128xf32, #tpu.memory_space<vmem>>, vector<8x128xf32>
    %4 = vector.extract_strided_slice %3 {offsets = [0, 0], sizes = [1, 128], strides = [1, 1]} : vector<8x128xf32> to vector<1x128xf32>
    %5 = vector.extract_strided_slice %3 {offsets = [1, 0], sizes = [1, 128], strides = [1, 1]} : vector<8x128xf32> to vector<1x128xf32>
    %6 = vector.extract_strided_slice %3 {offsets = [2, 0], sizes = [1, 128], strides = [1, 1]} : vector<8x128xf32> to vector<1x128xf32>
    %7 = vector.extract_strided_slice %3 {offsets = [3, 0], sizes = [1, 128], strides = [1, 1]} : vector<8x128xf32> to vector<1x128xf32>
    %8 = vector.extract_strided_slice %3 {offsets = [4, 0], sizes = [1, 128], strides = [1, 1]} : vector<8x128xf32> to vector<1x128xf32>
    %c392 = arith.constant 392 : index
    %c0_4 = arith.constant 0 : index
    %9 = vector.load %arg0[%c392, %c0_4] : memref<400x128xf32, #tpu.memory_space<vmem>>, vector<8x128xf32>
    %cst = arith.constant dense<0.000000e+00> : vector<8x128xf32>
    %10 = tpu.matmul %9, %0, %cst {dimension_numbers = #tpu.dot_dimension_numbers<[1], [0], [0], [1], [0, 0, 1, 1], [], []>} : vector<8x128xf32>, vector<128x128xf32>, vector<8x128xf32> -> vector<8x128xf32>
    %11 = vector.broadcast %4 : vector<1x128xf32> to vector<8x128xf32>
    %12 = arith.addf %10, %11 : vector<8x128xf32>
    %cst_5 = arith.constant 0.000000e+00 : f32
    %13 = vector.broadcast %cst_5 : f32 to vector<8x128xf32>
    %14 = arith.maximumf %12, %13 : vector<8x128xf32>
    %cst_6 = arith.constant dense<0.000000e+00> : vector<8x128xf32>
    %15 = tpu.matmul %14, %1, %cst_6 {dimension_numbers = #tpu.dot_dimension_numbers<[1], [0], [0], [1], [0, 0, 1, 1], [], []>} : vector<8x128xf32>, vector<128x128xf32>, vector<8x128xf32> -> vector<8x128xf32>
    %16 = vector.broadcast %5 : vector<1x128xf32> to vector<8x128xf32>
    %17 = arith.addf %15, %16 : vector<8x128xf32>
    %cst_7 = arith.constant 0.000000e+00 : f32
    %18 = vector.broadcast %cst_7 : f32 to vector<8x128xf32>
    %19 = arith.maximumf %17, %18 : vector<8x128xf32>
    %cst_8 = arith.constant dense<0.000000e+00> : vector<8x128xf32>
    %20 = tpu.matmul %19, %2, %cst_8 {dimension_numbers = #tpu.dot_dimension_numbers<[1], [0], [0], [1], [0, 0, 1, 1], [], []>} : vector<8x128xf32>, vector<128x128xf32>, vector<8x128xf32> -> vector<8x128xf32>
    %21 = vector.broadcast %6 : vector<1x128xf32> to vector<8x128xf32>
    %22 = arith.addf %20, %21 : vector<8x128xf32>
    %cst_9 = arith.constant dense<0.000000e+00> : vector<8xf32>
    %23 = vector.multi_reduction <add>, %22, %cst_9 [1] : vector<8x128xf32> to vector<8xf32>
    %24 = vector.shape_cast %23 : vector<8xf32> to vector<8x1xf32>
    %cst_10 = arith.constant 1.280000e+02 : f32
    %25 = vector.broadcast %cst_10 : f32 to vector<8x1xf32>
    %26 = arith.divf %24, %25 : vector<8x1xf32>
    %27 = vector.broadcast %26 : vector<8x1xf32> to vector<8x128xf32>
    %28 = arith.subf %22, %27 : vector<8x128xf32>
    %29 = arith.mulf %28, %28 : vector<8x128xf32>
    %cst_11 = arith.constant dense<0.000000e+00> : vector<8xf32>
    %30 = vector.multi_reduction <add>, %29, %cst_11 [1] : vector<8x128xf32> to vector<8xf32>
    %31 = vector.shape_cast %30 : vector<8xf32> to vector<8x1xf32>
    %cst_12 = arith.constant 1.280000e+02 : f32
    %32 = vector.broadcast %cst_12 : f32 to vector<8x1xf32>
    %33 = arith.divf %31, %32 : vector<8x1xf32>
    %cst_13 = arith.constant 9.99999974E-6 : f32
    %34 = vector.broadcast %cst_13 : f32 to vector<8x1xf32>
    %35 = arith.addf %33, %34 : vector<8x1xf32>
    %36 = math.rsqrt %35 : vector<8x1xf32>
    %37 = vector.broadcast %36 : vector<8x1xf32> to vector<8x128xf32>
    %38 = arith.mulf %28, %37 : vector<8x128xf32>
    %39 = vector.broadcast %7 : vector<1x128xf32> to vector<8x128xf32>
    %40 = arith.mulf %38, %39 : vector<8x128xf32>
    %41 = vector.broadcast %8 : vector<1x128xf32> to vector<8x128xf32>
    %42 = arith.addf %40, %41 : vector<8x128xf32>
    %c0_14 = arith.constant 0 : index
    %c0_15 = arith.constant 0 : index
    %43 = vector.load %arg1[%c0_14, %c0_15] : memref<8x128xf32, #tpu.memory_space<vmem>>, vector<8x128xf32>
    tpu.vector_store %arg1[%c0_14, %c0_15], %42 {strides = array<i32>} : memref<8x128xf32, #tpu.memory_space<vmem>>, vector<8x128xf32>,
    return
  }
}

</mosaic_0001>

<bundles_post_ra>
// kernel: tpu_custom_call.1
= control target key start
LH: loop header
LB: loop body
LE: loop exit
PB: predicated region body
PF: predicated region fallthrough
CT: control target
= control target key end

     0   :  { %6 = vsyncpa [#allocation3], 0  ;;  %s619_s0 = inlined_call_operand.hbm [shape: f32[400,128], index: 0, kind: input, shape index: {}]   ;;  %s620_s1 = inlined_call_operand.hbm [shape: f32[8,128], index: 1, kind: output, shape index: {}]  }
   0x1   :  { %7 = vsyncpa [#allocation4], 0  ;;  %s543_s6 = smov [#allocation2]  }
   0x2   :  { %s13_s7 = sshll.u32 %s543_s6, 4  ;;  %s14_s7 = int_to_ptr.vmem [resolvable:$true] %s13_s7 }
   0x3   :  { %s507_s8 = scalar_lea.vmem %s14_s7, 6400  ;;  %p512_p1 = scmp.lt.s32.totalorder %s14_s7, %s14_s7 }
   0x4   :  { %p508_p0 = scmp.ne.s32.totalorder %s14_s7, %s507_s8  ;;  %p513_p2 = scmp.lt.s32.totalorder %s507_s8, %s507_s8 }
   0x6   :  { %p514_p3 = por %p513_p2, %p512_p1 }
   0x8   :  { %p515_p4 = pnand %p514_p3, %p508_p0 }
   0xa   :  { %518 = shalt.err (!%p515_p4)
}
   0xb   :  { %s544_s9 = smov 128   ;;  %s545_s10 = smov 8  }
   0xc   :  { %19 = dma.hbm_to_vmem [thread:$0]  %s619_s0, 6400, %s14_s7, [#allocation3], %s544_s9, %s544_s9, %s545_s10  }
   0xd   :  { %539 = dma.done.wait [#allocation3], 6400  }
   0xe   :  { %540 = vsyncadd [#allocation3], 4294960896  ;;  %v546_v0 = vmov 0.0   ;;  %vm547_vm0 = vmmov 0   ;;  %v38_v1 = vld [vmem:[#allocation2 + $0x78] sm:$0xff]  ;;  %v37_v2 = vld [vmem:[#allocation2 + $0x70] sm:$0xff]  ;;  %v73_v47 = vlaneseq }
   0xf   :  { %386 = vmatprep.subr.mxu0 %v546_v0  ;;  %418 = vmatprep.mubr.msk.f32.mxu0 %vm547_vm0, %v546_v0  ;;  %v36_v3 = vld [vmem:[#allocation2 + $0x68] sm:$0xff]  ;;  %v35_v4 = vld [vmem:[#allocation2 + $0x60] sm:$0xff]  ;;  %v54_v5 = vld [vmem:[#allocation2 + $0xf8] sm:$0xff]  ;;  %s548_s0 = smov [#allocation5]  }
  0x10   :  { %421 = vmatprep.subr.mxu1 %v546_v0  ;;  %453 = vmatprep.mubr.msk.f32.mxu1 %vm547_vm0, %v546_v0  ;;  %v34_v6 = vld [vmem:[#allocation2 + $0x58] sm:$0xff]  ;;  %v53_v7 = vld [vmem:[#allocation2 + $0xf0] sm:$0xff]  ;;  %v52_v8 = vld [vmem:[#allocation2 + $0xe8] sm:$0xff]  ;;  %v74_v48 = vshrl.u32 %v73_v47, 7  ;;  %s326_s13 = sshll.u32 %s548_s0, 4  ;;  %s327_s13 = int_to_ptr.vmem [resolvable:$true] %s326_s13 }
  0x11   :  { %387 = vmatpush3.msra.mxu0 %v38_v1  ;;  %422 = vmatpush3.msra.mxu1 %v54_v5  ;;  %v33_v9 = vld [vmem:[#allocation2 + $0x50] sm:$0xff]  ;;  %v51_v10 = vld [vmem:[#allocation2 + $0xe0] sm:$0xff]  ;;  %v32_v11 = vld [vmem:[#allocation2 + $0x48] sm:$0xff]  ;;  %s519_s14 = scalar_lea.vmem %s327_s13, 128  ;;  %p524_p6 = scmp.lt.s32.totalorder %s327_s13, %s327_s13 }
  0x12   :  { %388 = vmatprep.subr.mxu0 %v546_v0  ;;  %423 = vmatprep.subr.mxu1 %v546_v0  ;;  %v50_v12 = vld [vmem:[#allocation2 + $0xd8] sm:$0xff]  ;;  %v31_v13 = vld [vmem:[#allocation2 + $0x40] sm:$0xff]  ;;  %v49_v14 = vld [vmem:[#allocation2 + $0xd0] sm:$0xff]  ;;  %v75_v49 = vsub.s32 0, %v74_v48  ;;  %v150_v59 = vsub.s32 1, %v74_v48  ;;  %p520_p5 = scmp.ne.s32.totalorder %s327_s13, %s519_s14  ;;  %p525_p7 = scmp.lt.s32.totalorder %s519_s14, %s519_s14 }
  0x13   :  { %389 = vmatpush3.msra.mxu0 %v37_v2  ;;  %424 = vmatpush3.msra.mxu1 %v53_v7  ;;  %v30_v15 = vld [vmem:[#allocation2 + $0x38] sm:$0xff]  ;;  %v48_v16 = vld [vmem:[#allocation2 + $0xc8] sm:$0xff]  ;;  %v29_v17 = vld [vmem:[#allocation2 + $0x30] sm:$0xff]  ;;  %v225_v2 = vsub.s32 2, %v74_v48 }
  0x14   :  { %390 = vmatprep.subr.mxu0 %v546_v0  ;;  %425 = vmatprep.subr.mxu1 %v546_v0  ;;  %v47_v18 = vld [vmem:[#allocation2 + $0xc0] sm:$0xff]  ;;  %v28_v19 = vld [vmem:[#allocation2 + $0x28] sm:$0xff]  ;;  %v46_v20 = vld [vmem:[#allocation2 + $0xb8] sm:$0xff]  ;;  %p526_p8 = por %p525_p7, %p524_p6 }
  0x15   :  { %391 = vmatpush3.msra.mxu0 %v36_v3  ;;  %426 = vmatpush3.msra.mxu1 %v52_v8  ;;  %v27_v21 = vld [vmem:[#allocation2 + $0x20] sm:$0xff]  ;;  %v45_v22 = vld [vmem:[#allocation2 + $0xb0] sm:$0xff]  ;;  %v26_v23 = vld [vmem:[#allocation2 + $0x18] sm:$0xff] }
  0x16   :  { %392 = vmatprep.subr.mxu0 %v546_v0  ;;  %427 = vmatprep.subr.mxu1 %v546_v0  ;;  %v44_v24 = vld [vmem:[#allocation2 + $0xa8] sm:$0xff]  ;;  %v25_v25 = vld [vmem:[#allocation2 + $0x10] sm:$0xff]  ;;  %v43_v26 = vld [vmem:[#allocation2 + $0xa0] sm:$0xff]  ;;  %p527_p9 = pnand %p526_p8, %p520_p5 }
  0x17   :  { %393 = vmatpush3.msra.mxu0 %v35_v4  ;;  %428 = vmatpush3.msra.mxu1 %v51_v10  ;;  %v24_v27 = vld [vmem:[#allocation2 + $0x8] sm:$0xff]  ;;  %v42_v28 = vld [vmem:[#allocation2 + $0x98] sm:$0xff]  ;;  %v23_v29 = vld [vmem:[#allocation2] sm:$0xff] }
  0x18   :  { %394 = vmatprep.subr.mxu0 %v546_v0  ;;  %429 = vmatprep.subr.mxu1 %v546_v0  ;;  %v72_v30 = vld [vmem:[#allocation2 + $0x188] sm:$0xff]  ;;  %v41_v31 = vld [vmem:[#allocation2 + $0x90] sm:$0xff]  ;;  %v39_v33 = vld [vmem:[#allocation2 + $0x80] sm:$0xff] }
  0x19   :  { %395 = vmatpush3.msra.mxu0 %v34_v6  ;;  %430 = vmatpush3.msra.mxu1 %v50_v12  ;;  %v40_v32 = vld [vmem:[#allocation2 + $0x88] sm:$0xff]  ;;  %v70_v34 = vld [vmem:[#allocation2 + $0x178] sm:$0xff]  ;;  %v69_v35 = vld [vmem:[#allocation2 + $0x170] sm:$0xff] }
  0x1a   :  { %396 = vmatprep.subr.mxu0 %v546_v0  ;;  %431 = vmatprep.subr.mxu1 %v546_v0  ;;  %v68_v36 = vld [vmem:[#allocation2 + $0x168] sm:$0xff]  ;;  %v67_v37 = vld [vmem:[#allocation2 + $0x160] sm:$0xff]  ;;  %v66_v38 = vld [vmem:[#allocation2 + $0x158] sm:$0xff] }
  0x1b   :  { %397 = vmatpush3.msra.mxu0 %v33_v9  ;;  %432 = vmatpush3.msra.mxu1 %v49_v14  ;;  %v65_v39 = vld [vmem:[#allocation2 + $0x150] sm:$0xff]  ;;  %v64_v40 = vld [vmem:[#allocation2 + $0x148] sm:$0xff]  ;;  %v63_v41 = vld [vmem:[#allocation2 + $0x140] sm:$0xff]  ;;  %v316_v14 = vsub.s32 4, %v74_v48 }
  0x1c   :  { %398 = vmatprep.subr.mxu0 %v546_v0  ;;  %433 = vmatprep.subr.mxu1 %v546_v0  ;;  %v62_v42 = vld [vmem:[#allocation2 + $0x138] sm:$0xff]  ;;  %v61_v43 = vld [vmem:[#allocation2 + $0x130] sm:$0xff]  ;;  %v60_v44 = vld [vmem:[#allocation2 + $0x128] sm:$0xff] }
  0x1d   :  { %399 = vmatpush3.msra.mxu0 %v32_v11  ;;  %434 = vmatpush3.msra.mxu1 %v48_v16  ;;  %v59_v45 = vld [vmem:[#allocation2 + $0x120] sm:$0xff]  ;;  %v58_v46 = vld [vmem:[#allocation2 + $0x118] sm:$0xff]  ;;  %v57_v56 = vld [vmem:[#allocation2 + $0x110] sm:$0xff] }
  0x1e   :  { %400 = vmatprep.subr.mxu0 %v546_v0  ;;  %435 = vmatprep.subr.mxu1 %v546_v0  ;;  %v71_v50 = vld [vmem:[#allocation2 + $0x180] sm:$0xff]  ;;  %v56_v57 = vld [vmem:[#allocation2 + $0x108] sm:$0xff] }
  0x1f   :  { %401 = vmatpush3.msra.mxu0 %v31_v13  ;;  %436 = vmatpush3.msra.mxu1 %v47_v18  ;;  %v76_v51 = vrot.slane %v71_v50, %v75_v49  ;;  %v55_v58 = vld [vmem:[#allocation2 + $0x100] sm:$0xff]  ;;  %v151_v60 = vrot.slane %v71_v50, %v150_v59  ;;  %v226_v3 = vrot.slane %v71_v50, %v225_v2  ;;  %v311_v13 = vsub.s32 3, %v74_v48 }
  0x20   :  { %402 = vmatprep.subr.mxu0 %v546_v0  ;;  %437 = vmatprep.subr.mxu1 %v546_v0  ;;  %v317_v18 = vrot.slane %v71_v50, %v316_v14 }
  0x21   :  { %403 = vmatpush3.msra.mxu0 %v30_v15  ;;  %438 = vmatpush3.msra.mxu1 %v46_v20  ;;  %v312_v15 = vrot.slane %v71_v50, %v311_v13 }
  0x22   :  { %404 = vmatprep.subr.mxu0 %v546_v0  ;;  %439 = vmatprep.subr.mxu1 %v546_v0 }
  0x23   :  { %405 = vmatpush3.msra.mxu0 %v29_v17  ;;  %440 = vmatpush3.msra.mxu1 %v45_v22 }
  0x24   :  { %406 = vmatprep.subr.mxu0 %v546_v0  ;;  %441 = vmatprep.subr.mxu1 %v546_v0 }
  0x25   :  { %407 = vmatpush3.msra.mxu0 %v28_v19  ;;  %442 = vmatpush3.msra.mxu1 %v44_v24 }
  0x26   :  { %408 = vmatprep.subr.mxu0 %v546_v0  ;;  %443 = vmatprep.subr.mxu1 %v546_v0 }
  0x27   :  { %409 = vmatpush3.msra.mxu0 %v27_v21  ;;  %444 = vmatpush3.msra.mxu1 %v43_v26 }
  0x28   :  { %410 = vmatprep.subr.mxu0 %v546_v0  ;;  %445 = vmatprep.subr.mxu1 %v546_v0 }
  0x29   :  { %411 = vmatpush3.msra.mxu0 %v26_v23  ;;  %446 = vmatpush3.msra.mxu1 %v42_v28 }
  0x2a   :  { %412 = vmatprep.subr.mxu0 %v546_v0  ;;  %447 = vmatprep.subr.mxu1 %v546_v0 }
  0x2b   :  { %413 = vmatpush3.msra.mxu0 %v25_v25  ;;  %448 = vmatpush3.msra.mxu1 %v41_v31 }
  0x2c   :  { %414 = vmatprep.subr.mxu0 %v546_v0  ;;  %449 = vmatprep.subr.mxu1 %v546_v0 }
  0x2d   :  { %415 = vmatpush3.msra.mxu0 %v24_v27  ;;  %450 = vmatpush3.msra.mxu1 %v40_v32 }
  0x2e   :  { %416 = vmatprep.subr.mxu0 %v546_v0  ;;  %451 = vmatprep.subr.mxu1 %v546_v0 }
  0x2f   :  { %417 = vmatpush3.msra.mxu0 %v23_v29  ;;  %452 = vmatpush3.msra.mxu1 %v39_v33 }
  0x30   :  { %419 = vmatmul.mubr.f32.vlgmr.msra.gmra.mxu0 %v72_v30  ;;  %456 = vmatprep.subr.mxu0 %v546_v0 }
  0x31   :  { %488 = vmatprep.mubr.msk.f32.mxu0 %vm547_vm0, %v546_v0  ;;  %457 = vmatpush3.msra.mxu0 %v70_v34 }
  0x32   :  { %458 = vmatprep.subr.mxu0 %v546_v0 }
  0x33   :  { %459 = vmatpush3.msra.mxu0 %v69_v35 }
  0x34   :  { %460 = vmatprep.subr.mxu0 %v546_v0 }
  0x35   :  { %461 = vmatpush3.msra.mxu0 %v68_v36 }
  0x36   :  { %462 = vmatprep.subr.mxu0 %v546_v0 }
  0x37   :  { %463 = vmatpush3.msra.mxu0 %v67_v37 }
  0x38   :  { %464 = vmatprep.subr.mxu0 %v546_v0 }
  0x39   :  { %465 = vmatpush3.msra.mxu0 %v66_v38 }
  0x3a   :  { %466 = vmatprep.subr.mxu0 %v546_v0 }
  0x3b   :  { %467 = vmatpush3.msra.mxu0 %v65_v39 }
  0x3c   :  { %468 = vmatprep.subr.mxu0 %v546_v0 }
  0x3d   :  { %469 = vmatpush3.msra.mxu0 %v64_v40 }
  0x3e   :  { %470 = vmatprep.subr.mxu0 %v546_v0 }
  0x3f   :  { %471 = vmatpush3.msra.mxu0 %v63_v41 }
  0x40   :  { %472 = vmatprep.subr.mxu0 %v546_v0 }
  0x41   :  { %473 = vmatpush3.msra.mxu0 %v62_v42 }
  0x42   :  { %474 = vmatprep.subr.mxu0 %v546_v0 }
  0x43   :  { %475 = vmatpush3.msra.mxu0 %v61_v43 }
  0x44   :  { %476 = vmatprep.subr.mxu0 %v546_v0 }
  0x45   :  { %477 = vmatpush3.msra.mxu0 %v60_v44 }
  0x46   :  { %478 = vmatprep.subr.mxu0 %v546_v0 }
  0x47   :  { %479 = vmatpush3.msra.mxu0 %v59_v45 }
  0x48   :  { %480 = vmatprep.subr.mxu0 %v546_v0 }
  0x49   :  { %481 = vmatpush3.msra.mxu0 %v58_v46 }
  0x4a   :  { %482 = vmatprep.subr.mxu0 %v546_v0 }
  0x4b   :  { %483 = vmatpush3.msra.mxu0 %v57_v56 }
  0x4c   :  { %484 = vmatprep.subr.mxu0 %v546_v0 }
  0x4d   :  { %485 = vmatpush3.msra.mxu0 %v56_v57 }
  0x4e   :  { %486 = vmatprep.subr.mxu0 %v546_v0 }
  0x4f   :  { %487 = vmatpush3.msra.mxu0 %v55_v58 }
  0xf0   :  { %v143_v52 = vpop.f32.mrf.mxu0 }
  0xf1   :  { %v144_v53 = vadd.f32 %v143_v52, %v76_v51 }
  0xf2   :  { %v420_v54 = vpop.f32.mrf.mxu0 }
  0xf3   :  { %v147_v55 = vmax.f32 %v144_v53, 0.0 }
  0xf5   :  { %454 = vmatmul.mubr.f32.vlgmr.msra.gmra.mxu1 %v147_v55 }
 0x1b5   :  { %v218_v61 = vpop.f32.mrf.mxu1 }
 0x1b6   :  { %v219_v62 = vadd.f32 %v218_v61, %v151_v60 }
 0x1b7   :  { %v455_v63 = vpop.f32.mrf.mxu1 }
 0x1b8   :  { %v222_v1 = vmax.f32 %v219_v62, 0.0 }
 0x1ba   :  { %489 = vmatmul.mubr.f32.vlgmr.msra.gmra.mxu0 %v222_v1 }
 0x27a   :  { %v293_v4 = vpop.f32.mrf.mxu0 }
 0x27b   :  { %v294_v5 = vadd.f32 %v293_v4, %v226_v3 }
 0x27c   :  { %v490_v6 = vpop.f32.mrf.mxu0 }
 0x27d   :  { %297 = vadd.xlane.f32.xlu0 %v294_v5 }
 0x306   :  { %v298_v7 = vpop.xlane.xlu0 %297 }
 0x307   :  { %v300_v8 = vmul.f32 0.0078125, %v298_v7 }
 0x309   :  { %v301_v9 = vsub.f32 %v294_v5, %v300_v8 }
 0x30b   :  { %v302_v10 = vmul.f32 %v301_v9, %v301_v9 }
 0x30d   :  { %303 = vadd.xlane.f32.xlu0 %v302_v10 }
 0x396   :  { %v304_v0 = vpop.xlane.xlu0 %303 }
 0x397   :  { %v305_v11 = vmul.f32 0.0078125, %v304_v0 }
 0x399   :  { %v306_v12 = vadd.f32 1e-05, %v305_v11 }
 0x39b   :  { %497 = vrsqrt.f32 %v306_v12 }
 0x3a8   :  { %v498_v16 = vpop.eup %497 }
 0x3a9   :  { %v308_v17 = vmul.f32 %v498_v16, %v301_v9 }
 0x3ab   :  { %v313_v19 = vmul.f32 %v312_v15, %v308_v17 }
 0x3ad   :  { %v318_v20 = vadd.f32 %v317_v18, %v313_v19 }
 0x3af   :  { %319 = vst [vmem:[#allocation5] sm:$0xff] %v318_v20 }
 0x3b0   :  { %530 = shalt.err (!%p527_p9)
}
 0x3b1   :  { %329 = dma.vmem_to_hbm [thread:$0]  %s327_s13, 128, %s620_s1, [#allocation4]  }
 0x3b2   :  { %541 = dma.done.wait [#allocation4], 128  }
 0x3b3   :  { %542 = vsyncadd [#allocation4], 4294967168 }
 0x3b4   :  { %333 = vsyncpa [#allocation3], 1 }
 0x3b5   :  { %334 = vsyncpa [#allocation4], 1 }

</bundles_post_ra>
